<compile_context>
chip_gen: v7x
topology: tpu7x:2x2x1
jax: 0.10.0
libtpu: 0.0.40
codegen_flags: <defaults>
</compile_context>

<pallas_src>
import jax
import jax.numpy as jnp
from jax.experimental import pallas as pl
from jax.experimental.pallas import tpu as pltpu

# ---------------- config (forward-consistent, MXU-friendly shapes) -----------
BATCH     = 256          # batch; grid = BATCH // TM = 2 (>=2 for v7x's 2 TCs)
INPUT_DIM = 32
N_LAYERS  = 3
N_HIDDEN  = 128
N_OUTPUT  = 1
TM        = 128          # batch tile: full MXU LHS panel per grid step


# ------------------------------- kernel --------------------------------------
def mlp_kernel(x_ref, w_stem_ref, b_stem_ref, w_hid_ref, b_hid_ref,
               w_out_ref, b_out_ref, o_ref):
    # stem: Linear(input_dim -> n_hidden) + ReLU
    # (weights already bf16; cast activations at the dot, accumulate f32)
    h = jnp.dot(x_ref[...].astype(jnp.bfloat16), w_stem_ref[...],
                preferred_element_type=jnp.float32) + b_stem_ref[...]
    h = jnp.maximum(h, 0.0)

    # hidden: n_layers x (Linear(n_hidden -> n_hidden) + ReLU)
    for l in range(N_LAYERS):          # static trip count -> unrolled
        h = jnp.dot(h.astype(jnp.bfloat16), w_hid_ref[l],
                    preferred_element_type=jnp.float32) + b_hid_ref[l]
        h = jnp.maximum(h, 0.0)

    # dropout (eval) = identity.
    # regressor Linear(n_hidden -> 1): VPU multiply + lane reduction instead of a
    # 1-column MXU matmul (w_out stored as a (1, n_hidden) f32 row).
    o = jnp.sum(h * w_out_ref[...], axis=-1, keepdims=True) + b_out_ref[...]
    o_ref[...] = o.astype(o_ref.dtype)


# ------------------------------- wrapper --------------------------------------
def mlp_forward(x, params):
    w_stem, b_stem, w_hid, b_hid, w_out, b_out = params
    B = x.shape[0]
    assert B % TM == 0, "batch must be a multiple of TM"
    grid = (B // TM,)

    return pl.pallas_call(
        mlp_kernel,
        out_shape=jax.ShapeDtypeStruct((B, N_OUTPUT), jnp.float32),
        grid_spec=pltpu.PrefetchScalarGridSpec(
            num_scalar_prefetch=0,
            grid=grid,
            in_specs=[
                pl.BlockSpec((TM, INPUT_DIM),            lambda i: (i, 0)),
                pl.BlockSpec((INPUT_DIM, N_HIDDEN),      lambda i: (0, 0)),
                pl.BlockSpec((1, N_HIDDEN),              lambda i: (0, 0)),
                pl.BlockSpec((N_LAYERS, N_HIDDEN, N_HIDDEN),
                                                         lambda i: (0, 0, 0)),
                pl.BlockSpec((N_LAYERS, 1, N_HIDDEN),    lambda i: (0, 0, 0)),
                pl.BlockSpec((1, N_HIDDEN),              lambda i: (0, 0)),
                pl.BlockSpec((1, N_OUTPUT),              lambda i: (0, 0)),
            ],
            out_specs=pl.BlockSpec((TM, N_OUTPUT),       lambda i: (i, 0)),
        ),
        compiler_params=pltpu.CompilerParams(
            dimension_semantics=("parallel",)),   # batch tiles shard across TCs on v7x
    )(x, w_stem, b_stem, w_hid, b_hid, w_out, b_out)


# --------------------------- deterministic init --------------------------------
def init_params(key):
    """Matches Net.init_weights: weight ~ U(-1/sqrt(in), 1/sqrt(in)), bias = 0.
    Matmul weights stored as [in, out] (transpose of nn.Linear) in bfloat16;
    biases and the regressor row stay f32 (elementwise / VPU path)."""
    ks = jax.random.split(key, 2 + N_LAYERS)
    y_stem = 1.0 / jnp.sqrt(float(INPUT_DIM))
    w_stem = jax.random.uniform(ks[0], (INPUT_DIM, N_HIDDEN), jnp.float32,
                                -y_stem, y_stem).astype(jnp.bfloat16)
    b_stem = jnp.zeros((1, N_HIDDEN), jnp.float32)

    y_h = 1.0 / jnp.sqrt(float(N_HIDDEN))
    w_hid = jnp.stack([
        jax.random.uniform(ks[1 + l], (N_HIDDEN, N_HIDDEN), jnp.float32,
                           -y_h, y_h)
        for l in range(N_LAYERS)
    ]).astype(jnp.bfloat16)
    b_hid = jnp.zeros((N_LAYERS, 1, N_HIDDEN), jnp.float32)

    # regressor weight kept as a (n_output, n_hidden) f32 row for the VPU path
    w_out = jax.random.uniform(ks[1 + N_LAYERS], (N_OUTPUT, N_HIDDEN),
                               jnp.float32, -y_h, y_h)
    b_out = jnp.zeros((1, N_OUTPUT), jnp.float32)
    return (w_stem, b_stem, w_hid, b_hid, w_out, b_out)


def mlp_reference(x, params):
    """Pure-JAX reference with identical bf16-at-the-dot / f32-accumulate numerics."""
    w_stem, b_stem, w_hid, b_hid, w_out, b_out = params
    h = jnp.dot(x.astype(jnp.bfloat16), w_stem,
                preferred_element_type=jnp.float32) + b_stem
    h = jnp.maximum(h, 0.0)
    for l in range(N_LAYERS):
        h = jnp.dot(h.astype(jnp.bfloat16), w_hid[l],
                    preferred_element_type=jnp.float32) + b_hid[l]
        h = jnp.maximum(h, 0.0)
    return jnp.sum(h * w_out, axis=-1, keepdims=True) + b_out


# ---------------------------------- main ---------------------------------------
if __name__ == "__main__":
    key = jax.random.PRNGKey(0)
    k_x, k_p = jax.random.split(key)

    x = jax.random.normal(k_x, (BATCH, INPUT_DIM), jnp.float32)
    params = init_params(k_p)

    out = mlp_forward(x, params)
    out = jax.block_until_ready(out)

    ref = mlp_reference(x, params)
    assert out.shape == (BATCH, N_OUTPUT), out.shape
    assert jnp.allclose(out, ref, atol=1e-3, rtol=1e-3), \
        f"max abs err {jnp.max(jnp.abs(out - ref))}"

    print("KERNEL_OK")
</pallas_src>

<mosaic_0001>
module attributes {stable_mosaic.version = 11 : i64} {
  func.func @mlp_kernel(%arg0: i32, %arg1: memref<128x32xf32, #tpu.memory_space<vmem>>, %arg2: memref<32x128xbf16, #tpu.memory_space<vmem>>, %arg3: memref<1x128xf32, #tpu.memory_space<vmem>>, %arg4: memref<3x128x128xbf16, #tpu.memory_space<vmem>>, %arg5: memref<3x1x128xf32, #tpu.memory_space<vmem>>, %arg6: memref<1x128xf32, #tpu.memory_space<vmem>>, %arg7: memref<1x1xf32, #tpu.memory_space<vmem>>, %arg8: memref<128x1xf32, #tpu.memory_space<vmem>>) attributes {dimension_semantics = [#tpu.dimension_semantics<parallel>], iteration_bounds = array<i64: 2>, scalar_prefetch = 0 : i64, scratch_operands = 0 : i64, tpu.core_type = #tpu.core_type<tc>, window_params = [{transform_indices = @transform_0, window_bounds = array<i64: 128, 32>}, {pipeline_mode = #tpu.pipeline_mode<synchronous>, transform_indices = @transform_1, window_bounds = array<i64: 32, 128>}, {pipeline_mode = #tpu.pipeline_mode<synchronous>, transform_indices = @transform_2, window_bounds = array<i64: 1, 128>}, {pipeline_mode = #tpu.pipeline_mode<synchronous>, transform_indices = @transform_3, window_bounds = array<i64: 3, 128, 128>}, {pipeline_mode = #tpu.pipeline_mode<synchronous>, transform_indices = @transform_4, window_bounds = array<i64: 3, 1, 128>}, {pipeline_mode = #tpu.pipeline_mode<synchronous>, transform_indices = @transform_5, window_bounds = array<i64: 1, 128>}, {pipeline_mode = #tpu.pipeline_mode<synchronous>, transform_indices = @transform_6, window_bounds = array<i64: 1, 1>}, {transform_indices = @transform_7, window_bounds = array<i64: 128, 1>}]} {
    %c0 = arith.constant 0 : index
    %c0_0 = arith.constant 0 : index
    %0 = vector.load %arg1[%c0, %c0_0] : memref<128x32xf32, #tpu.memory_space<vmem>>, vector<128x32xf32>
    %1 = arith.truncf %0 : vector<128x32xf32> to vector<128x32xbf16>
    %c0_1 = arith.constant 0 : index
    %c0_2 = arith.constant 0 : index
    %2 = vector.load %arg2[%c0_1, %c0_2] : memref<32x128xbf16, #tpu.memory_space<vmem>>, vector<32x128xbf16>
    %cst = arith.constant dense<0.000000e+00> : vector<128x128xf32>
    %3 = tpu.matmul %1, %2, %cst {dimension_numbers = #tpu.dot_dimension_numbers<[1], [0], [0], [1], [0, 0, 1, 1], [], []>} : vector<128x32xbf16>, vector<32x128xbf16>, vector<128x128xf32> -> vector<128x128xf32>
    %c0_3 = arith.constant 0 : index
    %c0_4 = arith.constant 0 : index
    %4 = vector.load %arg3[%c0_3, %c0_4] : memref<1x128xf32, #tpu.memory_space<vmem>>, vector<1x128xf32>
    %5 = vector.broadcast %4 : vector<1x128xf32> to vector<128x128xf32>
    %6 = arith.addf %3, %5 : vector<128x128xf32>
    %cst_5 = arith.constant 0.000000e+00 : f32
    %7 = vector.broadcast %cst_5 : f32 to vector<128x128xf32>
    %8 = arith.maximumf %6, %7 : vector<128x128xf32>
    %9 = arith.truncf %8 : vector<128x128xf32> to vector<128x128xbf16>
    %c0_6 = arith.constant 0 : index
    %c0_7 = arith.constant 0 : index
    %c0_8 = arith.constant 0 : index
    %10 = vector.load %arg4[%c0_6, %c0_7, %c0_8] : memref<3x128x128xbf16, #tpu.memory_space<vmem>>, vector<1x128x128xbf16>
    %11 = vector.shape_cast %10 : vector<1x128x128xbf16> to vector<128x128xbf16>
    %cst_9 = arith.constant dense<0.000000e+00> : vector<128x128xf32>
    %12 = tpu.matmul %9, %11, %cst_9 {dimension_numbers = #tpu.dot_dimension_numbers<[1], [0], [0], [1], [0, 0, 1, 1], [], []>} : vector<128x128xbf16>, vector<128x128xbf16>, vector<128x128xf32> -> vector<128x128xf32>
    %c0_10 = arith.constant 0 : index
    %c0_11 = arith.constant 0 : index
    %c0_12 = arith.constant 0 : index
    %13 = vector.load %arg5[%c0_10, %c0_11, %c0_12] : memref<3x1x128xf32, #tpu.memory_space<vmem>>, vector<1x1x128xf32>
    %14 = vector.shape_cast %13 : vector<1x1x128xf32> to vector<1x128xf32>
    %15 = vector.broadcast %14 : vector<1x128xf32> to vector<128x128xf32>
    %16 = arith.addf %12, %15 : vector<128x128xf32>
    %cst_13 = arith.constant 0.000000e+00 : f32
    %17 = vector.broadcast %cst_13 : f32 to vector<128x128xf32>
    %18 = arith.maximumf %16, %17 : vector<128x128xf32>
    %19 = arith.truncf %18 : vector<128x128xf32> to vector<128x128xbf16>
    %c1 = arith.constant 1 : index
    %c0_14 = arith.constant 0 : index
    %c0_15 = arith.constant 0 : index
    %20 = vector.load %arg4[%c1, %c0_14, %c0_15] : memref<3x128x128xbf16, #tpu.memory_space<vmem>>, vector<1x128x128xbf16>
    %21 = vector.shape_cast %20 : vector<1x128x128xbf16> to vector<128x128xbf16>
    %cst_16 = arith.constant dense<0.000000e+00> : vector<128x128xf32>
    %22 = tpu.matmul %19, %21, %cst_16 {dimension_numbers = #tpu.dot_dimension_numbers<[1], [0], [0], [1], [0, 0, 1, 1], [], []>} : vector<128x128xbf16>, vector<128x128xbf16>, vector<128x128xf32> -> vector<128x128xf32>
    %c1_17 = arith.constant 1 : index
    %c0_18 = arith.constant 0 : index
    %c0_19 = arith.constant 0 : index
    %23 = vector.load %arg5[%c1_17, %c0_18, %c0_19] : memref<3x1x128xf32, #tpu.memory_space<vmem>>, vector<1x1x128xf32>
    %24 = vector.shape_cast %23 : vector<1x1x128xf32> to vector<1x128xf32>
    %25 = vector.broadcast %24 : vector<1x128xf32> to vector<128x128xf32>
    %26 = arith.addf %22, %25 : vector<128x128xf32>
    %cst_20 = arith.constant 0.000000e+00 : f32
    %27 = vector.broadcast %cst_20 : f32 to vector<128x128xf32>
    %28 = arith.maximumf %26, %27 : vector<128x128xf32>
    %29 = arith.truncf %28 : vector<128x128xf32> to vector<128x128xbf16>
    %c2 = arith.constant 2 : index
    %c0_21 = arith.constant 0 : index
    %c0_22 = arith.constant 0 : index
    %30 = vector.load %arg4[%c2, %c0_21, %c0_22] : memref<3x128x128xbf16, #tpu.memory_space<vmem>>, vector<1x128x128xbf16>
    %31 = vector.shape_cast %30 : vector<1x128x128xbf16> to vector<128x128xbf16>
    %cst_23 = arith.constant dense<0.000000e+00> : vector<128x128xf32>
    %32 = tpu.matmul %29, %31, %cst_23 {dimension_numbers = #tpu.dot_dimension_numbers<[1], [0], [0], [1], [0, 0, 1, 1], [], []>} : vector<128x128xbf16>, vector<128x128xbf16>, vector<128x128xf32> -> vector<128x128xf32>
    %c2_24 = arith.constant 2 : index
    %c0_25 = arith.constant 0 : index
    %c0_26 = arith.constant 0 : index
    %33 = vector.load %arg5[%c2_24, %c0_25, %c0_26] : memref<3x1x128xf32, #tpu.memory_space<vmem>>, vector<1x1x128xf32>
    %34 = vector.shape_cast %33 : vector<1x1x128xf32> to vector<1x128xf32>
    %35 = vector.broadcast %34 : vector<1x128xf32> to vector<128x128xf32>
    %36 = arith.addf %32, %35 : vector<128x128xf32>
    %cst_27 = arith.constant 0.000000e+00 : f32
    %37 = vector.broadcast %cst_27 : f32 to vector<128x128xf32>
    %38 = arith.maximumf %36, %37 : vector<128x128xf32>
    %c0_28 = arith.constant 0 : index
    %c0_29 = arith.constant 0 : index
    %39 = vector.load %arg6[%c0_28, %c0_29] : memref<1x128xf32, #tpu.memory_space<vmem>>, vector<1x128xf32>
    %40 = vector.broadcast %39 : vector<1x128xf32> to vector<128x128xf32>
    %41 = arith.mulf %38, %40 : vector<128x128xf32>
    %cst_30 = arith.constant dense<0.000000e+00> : vector<128xf32>
    %42 = vector.multi_reduction <add>, %41, %cst_30 [1] : vector<128x128xf32> to vector<128xf32>
    %43 = vector.shape_cast %42 : vector<128xf32> to vector<128x1xf32>
    %c0_31 = arith.constant 0 : index
    %c0_32 = arith.constant 0 : index
    %44 = vector.load %arg7[%c0_31, %c0_32] : memref<1x1xf32, #tpu.memory_space<vmem>>, vector<1x1xf32>
    %45 = vector.broadcast %44 : vector<1x1xf32> to vector<128x1xf32>
    %46 = arith.addf %43, %45 : vector<128x1xf32>
    %c0_33 = arith.constant 0 : index
    %c0_34 = arith.constant 0 : index
    %47 = vector.load %arg8[%c0_33, %c0_34] : memref<128x1xf32, #tpu.memory_space<vmem>>, vector<128x1xf32>
    tpu.vector_store %arg8[%c0_33, %c0_34], %46 {strides = array<i32>} : memref<128x1xf32, #tpu.memory_space<vmem>>, vector<128x1xf32>,
    return
  }
  func.func @transform_0(%arg0: i32) -> (i32, i32) {
    %c0_i32 = arith.constant 0 : i32
    %c0_i32_0 = arith.constant 0 : i32
    return %arg0, %c0_i32 : i32, i32
  }
  func.func @transform_1(%arg0: i32) -> (i32, i32) {
    %c0_i32 = arith.constant 0 : i32
    %c0_i32_0 = arith.constant 0 : i32
    %c0_i32_1 = arith.constant 0 : i32
    return %c0_i32, %c0_i32_0 : i32, i32
  }
  func.func @transform_2(%arg0: i32) -> (i32, i32) {
    %c0_i32 = arith.constant 0 : i32
    %c0_i32_0 = arith.constant 0 : i32
    %c0_i32_1 = arith.constant 0 : i32
    return %c0_i32, %c0_i32_0 : i32, i32
  }
  func.func @transform_3(%arg0: i32) -> (i32, i32, i32) {
    %c0_i32 = arith.constant 0 : i32
    %c0_i32_0 = arith.constant 0 : i32
    %c0_i32_1 = arith.constant 0 : i32
    %c0_i32_2 = arith.constant 0 : i32
    return %c0_i32, %c0_i32_0, %c0_i32_1 : i32, i32, i32
  }
  func.func @transform_4(%arg0: i32) -> (i32, i32, i32) {
    %c0_i32 = arith.constant 0 : i32
    %c0_i32_0 = arith.constant 0 : i32
    %c0_i32_1 = arith.constant 0 : i32
    %c0_i32_2 = arith.constant 0 : i32
    return %c0_i32, %c0_i32_0, %c0_i32_1 : i32, i32, i32
  }
  func.func @transform_5(%arg0: i32) -> (i32, i32) {
    %c0_i32 = arith.constant 0 : i32
    %c0_i32_0 = arith.constant 0 : i32
    %c0_i32_1 = arith.constant 0 : i32
    return %c0_i32, %c0_i32_0 : i32, i32
  }
  func.func @transform_6(%arg0: i32) -> (i32, i32) {
    %c0_i32 = arith.constant 0 : i32
    %c0_i32_0 = arith.constant 0 : i32
    %c0_i32_1 = arith.constant 0 : i32
    return %c0_i32, %c0_i32_0 : i32, i32
  }
  func.func @transform_7(%arg0: i32) -> (i32, i32) {
    %c0_i32 = arith.constant 0 : i32
    %c0_i32_0 = arith.constant 0 : i32
    return %arg0, %c0_i32 : i32, i32
  }
}

</mosaic_0001>

<bundles_post_ra>
// kernel: tpu_custom_call.1
= control target key start
LH: loop header
LB: loop body
LE: loop exit
PB: predicated region body
PF: predicated region fallthrough
CT: control target
= control target key end

     0   :  { %s1561_s26 = smov 0   ;;  %s1810_s0 = inlined_call_operand.vmem [shape: f32[256,32], index: 0, kind: input, shape index: {}]   ;;  %s1811_s1 = inlined_call_operand.vmem [shape: bf16[32,128], index: 1, kind: input, shape index: {}]   ;;  %s1812_s2 = inlined_call_operand.vmem [shape: f32[1,128], index: 2, kind: input, shape index: {}]   ;;  %s1813_s3 = inlined_call_operand.vmem [shape: bf16[3,128,128], index: 3, kind: input, shape index: {}]   ;;  %s1814_s4 = inlined_call_operand.vmem [shape: f32[3,1,128], index: 4, kind: input, shape index: {}]   ;;  %s1815_s5 = inlined_call_operand.vmem [shape: f32[1,128], index: 5, kind: input, shape index: {}]   ;;  %s1816_s6 = inlined_call_operand.<no memory space> [shape: f32[1,1], index: 6, kind: input, shape index: {}]   ;;  %s1817_s7 = inlined_call_operand.vmem [shape: f32[256,1], index: 7, kind: output, shape index: {}]  }
   0x1   :  { %v12_v0 = vstv %s1816_s6 }
   0x2   :  { %13 = vst [vmem:[#allocation2] sm:$0x1] %v12_v0 }
   0x3 LB: > { %s1201_s27 = sadd.s32 4294967295, %s1516_s26   ;;  %p1205_p0 = scmp.ge.s32.totalorder %s1516_s26, 1  ;;  %s1516_s26 = sphi %s1561_s26, %s19_s26  }
   0x4   : > { %p240_p1 = scmp.lt.s32.totalorder %s1516_s26, 3 }
   0x6   : > { %p241_p2 = pnand %p1205_p0, %p240_p1 }
   0x7   : > { %v1484_v1 = vld [vmem:[%s1811_s1] sm:$0xff] (!%p241_p2)   ;;  %s1206_s6 = sshll.u32 (!%p241_p2), %s1201_s27, 4  ;;  %v1485_v2 = vld [vmem:[%s1811_s1 + $0x8] sm:$0xff] (!%p241_p2)   ;;  %v1488_v5 = vld [vmem:[%s1813_s3 + $0x10] sm:$0xff] (!%p241_p2)   ;;  %vm332_vm0 = vcmask (!%p241_p2), 261120   ;;  %vm1128_vm1 = vcmask (!%p241_p2), 7168  }
   0x8   : > { %244 = sbr.rel (%p241_p2) target bundleno = 1082 (0x43a), region = 48  ;;  %p273_p3 = scmp.lt.s32.totalorder (!%p241_p2), %s1206_s6, 31  ;;  %1344 = vmatprep.subr.bf16.mxu0 (!%p241_p2), %v1484_v1  ;;  %v1486_v3 = vld [vmem:[%s1813_s3] sm:$0xff] (!%p241_p2)   ;;  %v1487_v4 = vld [vmem:[%s1813_s3 + $0x8] sm:$0xff] (!%p241_p2)   ;;  %v1489_v15 = vld [vmem:[%s1813_s3 + $0x18] sm:$0xff] (!%p241_p2)  }
   0x9   : > { %1345 = vmatpush3.bf16.msra.mxu0 (!%p241_p2), %v1484_v1  ;;  %1364 = vmatprep.subr.bf16.mxu1 (!%p241_p2), %v1486_v3  ;;  %v1490_v19 = vld [vmem:[%s1813_s3 + $0x20] sm:$0xff] (!%p241_p2)   ;;  %v1491_v23 = vld [vmem:[%s1813_s3 + $0x28] sm:$0xff] (!%p241_p2)   ;;  %v1492_v33 = vld [vmem:[%s1813_s3 + $0x30] sm:$0xff] (!%p241_p2)  }
   0xa   : > { %1346 = vmatprep.subr.bf16.mxu0 (!%p241_p2), %v1485_v2  ;;  %1365 = vmatpush3.bf16.msra.mxu1 (!%p241_p2), %v1486_v3  ;;  %v1493_v34 = vld [vmem:[%s1813_s3 + $0x38] sm:$0xff] (!%p241_p2)   ;;  %v1494_v35 = vld [vmem:[%s1813_s3 + $0x40] sm:$0xff] (!%p241_p2)   ;;  %v1495_v36 = vld [vmem:[%s1813_s3 + $0x48] sm:$0xff] (!%p241_p2)  }
   0xb   : > { %1366 = vmatprep.subr.bf16.mxu1 (!%p241_p2), %v1487_v4  ;;  %v1496_v37 = vld [vmem:[%s1813_s3 + $0x50] sm:$0xff] (!%p241_p2)   ;;  %v1497_v38 = vld [vmem:[%s1813_s3 + $0x58] sm:$0xff] (!%p241_p2)   ;;  %v1498_v39 = vld [vmem:[%s1813_s3 + $0x60] sm:$0xff] (!%p241_p2)  }
   0xc   : > { %v1499_v40 = vld [vmem:[%s1813_s3 + $0x68] sm:$0xff] (!%p241_p2)   ;;  %v1210_v41 = vld [vmem:[%s1812_s2] ss:$0 sm:$0xff] (!%p241_p2) }
   0xd   : > { %1347 = vmatpush3.bf16.msra.mxu0 (!%p241_p2), %v1485_v2 }
   0xe   : > { %1367 = vmatpush3.bf16.msra.mxu1 (!%p241_p2), %v1487_v4  ;;  %1396 = vmatprep.subr.bf16.mxu0 (!%p241_p2), %v1494_v35 }
   0xf   : > { %s1819_s6 = smov (!%p273_p3, %s1206_s6), 31  ;;  %1368 = vmatprep.subr.bf16.mxu1 %v1488_v5 }
  0x10   : > { %s1207_s13 = sshll.u32 %s1819_s6, 3 }
  0x11   : > { %s1589_s16 = scalar_lea.vmem %s1810_s0, %s1207_s13  ;;  %s1773_s9 = scalar_lea.vmem %s1817_s7, %s1207_s13 }
  0x12   : > { %v285_v6 = vld [vmem:[%s1589_s16] sm:$0xff]  ;;  %v286_v7 = vld [vmem:[%s1589_s16 + $0x8] sm:$0xff]  ;;  %v287_v8 = vld [vmem:[%s1589_s16 + $0x10] sm:$0xff]  ;;  %1369 = vmatpush3.bf16.msra.mxu1 %v1488_v5 }
  0x13   : > { %v301_v9 = vpack.c.bf16 %v286_v7, %v285_v6  ;;  %v288_v10 = vld [vmem:[%s1589_s16 + $0x18] sm:$0xff]  ;;  %v289_v11 = vld [vmem:[%s1589_s16 + $0x20] sm:$0xff]  ;;  %v290_v12 = vld [vmem:[%s1589_s16 + $0x28] sm:$0xff]  ;;  %1370 = vmatprep.subr.bf16.mxu1 %v1489_v15 }
  0x14   : > { %v302_v13 = vpack.c.bf16 %v288_v10, %v287_v8  ;;  %v303_v14 = vpack.c.bf16 %v290_v12, %v289_v11  ;;  %v291_v16 = vld [vmem:[%s1589_s16 + $0x30] sm:$0xff]  ;;  %v292_v17 = vld [vmem:[%s1589_s16 + $0x38] sm:$0xff]  ;;  %v293_v18 = vld [vmem:[%s1589_s16 + $0x40] sm:$0xff] }
  0x15   : > { %1348 = vmatprep.mubr.msk.bf16.mxu0 %vm332_vm0, %v301_v9  ;;  %v294_v20 = vld [vmem:[%s1589_s16 + $0x48] sm:$0xff]  ;;  %v304_v21 = vpack.c.bf16 %v292_v17, %v291_v16  ;;  %v295_v24 = vld [vmem:[%s1589_s16 + $0x50] sm:$0xff]  ;;  %v296_v25 = vld [vmem:[%s1589_s16 + $0x58] sm:$0xff] }
  0x16   : > { %1349 = vmatmul.mubr.msk.bf16.vlgmr.msra.gmra.mrb[0].mxu0 %vm332_vm0, %v302_v13  ;;  %v305_v22 = vpack.c.bf16 %v294_v20, %v293_v18  ;;  %1371 = vmatpush3.bf16.msra.mxu1 %v1489_v15  ;;  %v297_v26 = vld [vmem:[%s1589_s16 + $0x60] sm:$0xff]  ;;  %v298_v27 = vld [vmem:[%s1589_s16 + $0x68] sm:$0xff]  ;;  %v306_v28 = vpack.c.bf16 %v296_v25, %v295_v24  ;;  %v299_v30 = vld [vmem:[%s1589_s16 + $0x70] sm:$0xff] }
  0x17   : > { %1352 = vmatprep.mubr.msk.bf16.mxu0 %vm332_vm0, %v303_v14  ;;  %1372 = vmatprep.subr.bf16.mxu1 %v1490_v19  ;;  %v307_v29 = vpack.c.bf16 %v298_v27, %v297_v26  ;;  %v300_v31 = vld [vmem:[%s1589_s16 + $0x78] sm:$0xff] }
  0x18   : > { %v308_v32 = vpack.c.bf16 %v300_v31, %v299_v30  ;;  %1397 = vmatpush3.bf16.msra.mxu0 %v1494_v35  ;;  %v1501_v35 = vld [vmem:[%s1813_s3 + $0x78] sm:$0xff]  }
  0x19   : > { %1398 = vmatprep.subr.bf16.mxu0 %v1495_v36 }
  0x1a   : > { %1373 = vmatpush3.bf16.msra.mxu1 %v1490_v19 }
  0x1b   : > { %1374 = vmatprep.subr.bf16.mxu1 %v1491_v23 }
  0x1c   : > { %1399 = vmatpush3.bf16.msra.mxu0 %v1495_v36  ;;  %v1502_v36 = vld [vmem:[%s1813_s3 + $0x80] sm:$0xff]  }
  0x1d   : > { %1400 = vmatprep.subr.bf16.mxu0 %v1496_v37 }
  0x1e   : > { %1353 = vmatmul.mubr.msk.bf16.gmra.mrb[4].mxu0 %vm332_vm0, %v304_v21  ;;  %1375 = vmatpush3.bf16.msra.mxu1 %v1491_v23 }
  0x1f   : > { %1356 = vmatprep.mubr.msk.bf16.mxu0 %vm332_vm0, %v305_v22  ;;  %1376 = vmatprep.subr.bf16.mxu1 %v1492_v33 }
  0x20   : > { %1401 = vmatpush3.bf16.msra.mxu0 %v1496_v37  ;;  %v1503_v37 = vld [vmem:[%s1813_s3 + $0x88] sm:$0xff]  }
  0x21   : > { %1402 = vmatprep.subr.bf16.mxu0 %v1497_v38 }
  0x22   : > { %1377 = vmatpush3.bf16.msra.mxu1 %v1492_v33 }
  0x23   : > { %1378 = vmatprep.subr.bf16.mxu1 %v1493_v34 }
  0x24   : > { %1403 = vmatpush3.bf16.msra.mxu0 %v1497_v38  ;;  %v1504_v38 = vld [vmem:[%s1813_s3 + $0x90] sm:$0xff]  }
  0x25   : > { %1404 = vmatprep.subr.bf16.mxu0 %v1498_v39 }
  0x26   : > { %1357 = vmatmul.mubr.msk.bf16.gmra.mrb[8].mxu0 %vm332_vm0, %v306_v28  ;;  %1379 = vmatpush3.bf16.msra.mxu1 %v1493_v34  ;;  %v1500_v34 = vld [vmem:[%s1813_s3 + $0x70] sm:$0xff]  }
  0x27   : > { %1360 = vmatprep.mubr.msk.bf16.mxu0 %vm332_vm0, %v307_v29  ;;  %1460 = vmatprep.subr.bf16.mxu1 %v1502_v36 }
  0x28   : > { %1405 = vmatpush3.bf16.msra.mxu0 %v1498_v39  ;;  %v1672_v39 = vld [vmem:[%s1813_s3 + $0x98] sm:$0xff]  }
  0x29   : > { %1406 = vmatprep.subr.bf16.mxu0 %v1499_v40 }
  0x2c   : > { %1407 = vmatpush3.bf16.msra.mxu0 %v1499_v40  ;;  %v1678_v40 = vld [vmem:[%s1813_s3 + $0xa0] sm:$0xff]  }
  0x2d   : > { %1408 = vmatprep.subr.bf16.mxu0 %v1500_v34 }
  0x2e   : > { %1361 = vmatmul.mubr.msk.bf16.gmra.mrb[12].mxu0 %vm332_vm0, %v308_v32 }
  0x30   : > { %1409 = vmatpush3.bf16.msra.mxu0 %v1500_v34 }
  0x31   : > { %1410 = vmatprep.subr.bf16.mxu0 %v1501_v35 }
  0x34   : > { %1411 = vmatpush3.bf16.msra.mxu0 %v1501_v35  ;;  %v1508_v35 = vld [vmem:[%s1813_s3 + $0xb0] sm:$0xff]  }
  0x35   : > { %1428 = vmatprep.subr.bf16.mxu0 %v1502_v36 }
  0xe9   : > { %v1350_v42 = vpop.f32.mrb[0].mxu0 }
  0xea   : > { %v400_v43 = vadd.f32 %v1350_v42, %v1210_v41  ;;  %v391_v44 = vpop.f32.mrb[1].mxu0  ;;  %v1693_v42 = vld [vmem:[%s1814_s4] ss:$0 sm:$0xff] }
  0xeb   : > { %v392_v45 = vadd.f32 %v1210_v41, %v391_v44  ;;  %v1351_v46 = vpop.f32.mrb[2].mxu0 }
  0xec   : > { %v403_v47 = vadd.f32 %v1351_v46, %v1210_v41  ;;  %v394_v48 = vpop.f32.mrb[3].mxu0  ;;  %v456_v50 = vmax.f32 %v400_v43, 0.0 }
  0xed   : > { %v395_v49 = vadd.f32 %v1210_v41, %v394_v48  ;;  %v454_v52 = vmax.f32 %v392_v45, 0.0 }
  0xee   : > { %v457_v51 = vmax.f32 %v403_v47, 0.0 }
  0xef   : > { %v455_v53 = vmax.f32 %v395_v49, 0.0 }
  0xf0   : > { %v471_v54 = vpack.c.bf16 %v457_v51, %v456_v50 }
  0xf1   : > { %v1354_v55 = vpop.f32.mrb[4].mxu0  ;;  %v470_v56 = vpack.c.bf16 %v455_v53, %v454_v52 }
  0xf2   : > { %v416_v57 = vadd.f32 %v1354_v55, %v1210_v41  ;;  %v407_v58 = vpop.f32.mrb[5].mxu0 }
  0xf3   : > { %v408_v59 = vadd.f32 %v1210_v41, %v407_v58  ;;  %v1355_v60 = vpop.f32.mrb[6].mxu0  ;;  %1380 = vmatprep.mubr.bf16.mxu1 %v470_v56 }
  0xf4   : > { %v419_v61 = vadd.f32 %v1355_v60, %v1210_v41  ;;  %v410_v62 = vpop.f32.mrb[7].mxu0  ;;  %1381 = vmatmul.mubr.bf16.vlgmr.msra.gmra.mrb[0].mxu1 %v471_v54  ;;  %v460_v0 = vmax.f32 %v416_v57, 0.0 }
  0xf5   : > { %v411_v63 = vadd.f32 %v1210_v41, %v410_v62  ;;  %v458_v2 = vmax.f32 %v408_v59, 0.0  ;;  %1468 = vmatpush3.bf16.msra.mxu1 %v1502_v36 }
  0xf6   : > { %v461_v1 = vmax.f32 %v419_v61, 0.0  ;;  %1461 = vmatprep.subr.bf16.mxu1 %v1503_v37 }
  0xf7   : > { %v459_v3 = vmax.f32 %v411_v63, 0.0 }
  0xf8   : > { %v473_v4 = vpack.c.bf16 %v461_v1, %v460_v0 }
  0xf9   : > { %v472_v5 = vpack.c.bf16 %v459_v3, %v458_v2  ;;  %v1358_v6 = vpop.f32.mrb[8].mxu0  ;;  %1469 = vmatpush3.bf16.msra.mxu1 %v1503_v37 }
  0xfa   : > { %v432_v7 = vadd.f32 %v1358_v6, %v1210_v41  ;;  %v423_v8 = vpop.f32.mrb[9].mxu0  ;;  %1462 = vmatprep.subr.bf16.mxu1 %v1504_v38 }
  0xfb   : > { %v424_v9 = vadd.f32 %v1210_v41, %v423_v8  ;;  %v1359_v10 = vpop.f32.mrb[10].mxu0  ;;  %1384 = vmatprep.mubr.bf16.mxu1 %v472_v5 }
  0xfc   : > { %v435_v11 = vadd.f32 %v1359_v10, %v1210_v41  ;;  %v426_v12 = vpop.f32.mrb[11].mxu0  ;;  %1385 = vmatmul.mubr.bf16.gmra.mrb[4].mxu1 %v473_v4  ;;  %v464_v14 = vmax.f32 %v432_v7, 0.0 }
  0xfd   : > { %v427_v13 = vadd.f32 %v1210_v41, %v426_v12  ;;  %v462_v16 = vmax.f32 %v424_v9, 0.0  ;;  %1470 = vmatpush3.bf16.msra.mxu1 %v1504_v38 }
  0xfe   : > { %v465_v15 = vmax.f32 %v435_v11, 0.0  ;;  %1463 = vmatprep.subr.bf16.mxu1 %v1672_v39 }
  0xff   : > { %v463_v17 = vmax.f32 %v427_v13, 0.0 }
 0x100   : > { %v475_v18 = vpack.c.bf16 %v465_v15, %v464_v14 }
 0x101   : > { %v474_v19 = vpack.c.bf16 %v463_v17, %v462_v16  ;;  %v1362_v20 = vpop.f32.mrb[12].mxu0  ;;  %1471 = vmatpush3.bf16.msra.mxu1 %v1672_v39 }
 0x102   : > { %v448_v21 = vadd.f32 %v1362_v20, %v1210_v41  ;;  %v439_v22 = vpop.f32.mrb[13].mxu0  ;;  %1464 = vmatprep.subr.bf16.mxu1 %v1678_v40 }
 0x103   : > { %v440_v23 = vadd.f32 %v1210_v41, %v439_v22  ;;  %v1363_v24 = vpop.f32.mrb[14].mxu0  ;;  %1388 = vmatprep.mubr.bf16.mxu1 %v474_v19 }
 0x104   : > { %v451_v25 = vadd.f32 %v1363_v24, %v1210_v41  ;;  %v442_v26 = vpop.f32.mrb[15].mxu0  ;;  %1389 = vmatmul.mubr.bf16.gmra.mrb[8].mxu1 %v475_v18  ;;  %v468_v28 = vmax.f32 %v448_v21, 0.0 }
 0x105   : > { %v443_v27 = vadd.f32 %v1210_v41, %v442_v26  ;;  %v466_v30 = vmax.f32 %v440_v23, 0.0  ;;  %v1685_v41 = vld [vmem:[%s1813_s3 + $0xa8] sm:$0xff]   ;;  %1472 = vmatpush3.bf16.msra.mxu1 %v1678_v40 }
 0x106   : > { %v469_v29 = vmax.f32 %v451_v25, 0.0  ;;  %1465 = vmatprep.subr.bf16.mxu1 %v1685_v41 }
 0x107   : > { %v467_v31 = vmax.f32 %v443_v27, 0.0 }
 0x108   : > { %v477_v32 = vpack.c.bf16 %v469_v29, %v468_v28 }
 0x109   : > { %v476_v33 = vpack.c.bf16 %v467_v31, %v466_v30  ;;  %1473 = vmatpush3.bf16.msra.mxu1 %v1685_v41 }
 0x10a   : > { %1466 = vmatprep.subr.bf16.mxu1 %v1508_v35 }
 0x10b   : > { %1392 = vmatprep.mubr.bf16.mxu1 %v476_v33 }
 0x10c   : > { %1393 = vmatmul.mubr.bf16.gmra.mrb[12].mxu1 %v477_v32 }
 0x10d   : > { %1474 = vmatpush3.bf16.msra.mxu1 %v1508_v35 }
 0x1c7   : > { %v1382_v43 = vpop.f32.mrb[0].mxu1 }
 0x1c8   : > { %v592_v44 = vadd.f32 %v1382_v43, %v1693_v42  ;;  %v583_v45 = vpop.f32.mrb[1].mxu1 }
 0x1c9   : > { %v584_v46 = vadd.f32 %v1693_v42, %v583_v45  ;;  %v1383_v47 = vpop.f32.mrb[2].mxu1 }
 0x1ca   : > { %v595_v48 = vadd.f32 %v1383_v47, %v1693_v42  ;;  %v586_v49 = vpop.f32.mrb[3].mxu1  ;;  %v648_v51 = vmax.f32 %v592_v44, 0.0 }
 0x1cb   : > { %v587_v50 = vadd.f32 %v1693_v42, %v586_v49  ;;  %v646_v53 = vmax.f32 %v584_v46, 0.0 }
 0x1cc   : > { %v649_v52 = vmax.f32 %v595_v48, 0.0 }
 0x1cd   : > { %v647_v54 = vmax.f32 %v587_v50, 0.0 }
 0x1ce   : > { %v663_v55 = vpack.c.bf16 %v649_v52, %v648_v51 }
 0x1cf   : > { %v662_v56 = vpack.c.bf16 %v647_v54, %v646_v53  ;;  %v1386_v57 = vpop.f32.mrb[4].mxu1 }
 0x1d0   : > { %v608_v58 = vadd.f32 %v1386_v57, %v1693_v42  ;;  %v599_v59 = vpop.f32.mrb[5].mxu1 }
 0x1d1   : > { %v600_v60 = vadd.f32 %v1693_v42, %v599_v59  ;;  %v1387_v61 = vpop.f32.mrb[6].mxu1  ;;  %1412 = vmatprep.mubr.bf16.mxu0 %v662_v56 }
 0x1d2   : > { %v611_v62 = vadd.f32 %v1387_v61, %v1693_v42  ;;  %v602_v63 = vpop.f32.mrb[7].mxu1  ;;  %1413 = vmatmul.mubr.bf16.vlgmr.msra.gmra.mrb[16].mxu0 %v663_v55  ;;  %v652_v1 = vmax.f32 %v608_v58, 0.0 }
 0x1d3   : > { %v603_v0 = vadd.f32 %v1693_v42, %v602_v63  ;;  %1429 = vmatpush3.bf16.msra.mxu0 %v1502_v36  ;;  %v650_v3 = vmax.f32 %v600_v60, 0.0  ;;  %v1509_v36 = vld [vmem:[%s1813_s3 + $0xb8] sm:$0xff]  }
 0x1d4   : > { %v653_v2 = vmax.f32 %v611_v62, 0.0  ;;  %1430 = vmatprep.subr.bf16.mxu0 %v1503_v37  ;;  %1467 = vmatprep.subr.bf16.mxu1 %v1509_v36 }
 0x1d5   : > { %v651_v4 = vmax.f32 %v603_v0, 0.0  ;;  %1475 = vmatpush3.bf16.msra.mxu1 %v1509_v36 }
 0x1d6   : > { %v665_v5 = vpack.c.bf16 %v653_v2, %v652_v1 }
 0x1d7   : > { %v664_v6 = vpack.c.bf16 %v651_v4, %v650_v3  ;;  %v1390_v7 = vpop.f32.mrb[8].mxu1  ;;  %1431 = vmatpush3.bf16.msra.mxu0 %v1503_v37  ;;  %v1247_v37 = vld [vmem:[%s1814_s4 + $0x1] ss:$0 sm:$0xff] }
 0x1d8   : > { %v624_v8 = vadd.f32 %v1390_v7, %v1693_v42  ;;  %v615_v9 = vpop.f32.mrb[9].mxu1  ;;  %1432 = vmatprep.subr.bf16.mxu0 %v1504_v38 }
 0x1d9   : > { %v616_v10 = vadd.f32 %v1693_v42, %v615_v9  ;;  %v1391_v11 = vpop.f32.mrb[10].mxu1  ;;  %1416 = vmatprep.mubr.bf16.mxu0 %v664_v6 }
 0x1da   : > { %v627_v12 = vadd.f32 %v1391_v11, %v1693_v42  ;;  %v618_v13 = vpop.f32.mrb[11].mxu1  ;;  %1417 = vmatmul.mubr.bf16.gmra.mrb[20].mxu0 %v665_v5  ;;  %v656_v15 = vmax.f32 %v624_v8, 0.0 }
 0x1db   : > { %v619_v14 = vadd.f32 %v1693_v42, %v618_v13  ;;  %1433 = vmatpush3.bf16.msra.mxu0 %v1504_v38  ;;  %v654_v17 = vmax.f32 %v616_v10, 0.0 }
 0x1dc   : > { %v657_v16 = vmax.f32 %v627_v12, 0.0  ;;  %1434 = vmatprep.subr.bf16.mxu0 %v1672_v39 }
 0x1dd   : > { %v655_v18 = vmax.f32 %v619_v14, 0.0 }
 0x1de   : > { %v667_v19 = vpack.c.bf16 %v657_v16, %v656_v15 }
 0x1df   : > { %v666_v20 = vpack.c.bf16 %v655_v18, %v654_v17  ;;  %v1394_v21 = vpop.f32.mrb[12].mxu1  ;;  %1435 = vmatpush3.bf16.msra.mxu0 %v1672_v39 }
 0x1e0   : > { %v640_v22 = vadd.f32 %v1394_v21, %v1693_v42  ;;  %v631_v23 = vpop.f32.mrb[13].mxu1  ;;  %1436 = vmatprep.subr.bf16.mxu0 %v1678_v40 }
 0x1e1   : > { %v632_v24 = vadd.f32 %v1693_v42, %v631_v23  ;;  %v1395_v25 = vpop.f32.mrb[14].mxu1  ;;  %1420 = vmatprep.mubr.bf16.mxu0 %v666_v20 }
 0x1e2   : > { %v643_v26 = vadd.f32 %v1395_v25, %v1693_v42  ;;  %v634_v27 = vpop.f32.mrb[15].mxu1  ;;  %1421 = vmatmul.mubr.bf16.gmra.mrb[24].mxu0 %v667_v19  ;;  %v660_v29 = vmax.f32 %v640_v22, 0.0 }
 0x1e3   : > { %v635_v28 = vadd.f32 %v1693_v42, %v634_v27  ;;  %1437 = vmatpush3.bf16.msra.mxu0 %v1678_v40  ;;  %v658_v31 = vmax.f32 %v632_v24, 0.0 }
 0x1e4   : > { %v661_v30 = vmax.f32 %v643_v26, 0.0  ;;  %1438 = vmatprep.subr.bf16.mxu0 %v1685_v41 }
 0x1e5   : > { %v659_v32 = vmax.f32 %v635_v28, 0.0 }
 0x1e6   : > { %v669_v33 = vpack.c.bf16 %v661_v30, %v660_v29  ;;  %v1729_v30 = vld [vmem:[%s1814_s4 + $0x2] ss:$0 sm:$0xff] }
 0x1e7   : > { %v668_v34 = vpack.c.bf16 %v659_v32, %v658_v31  ;;  %1439 = vmatpush3.bf16.msra.mxu0 %v1685_v41 }
 0x1e8   : > { %1440 = vmatprep.subr.bf16.mxu0 %v1508_v35 }
 0x1e9   : > { %1424 = vmatprep.mubr.bf16.mxu0 %v668_v34 }
 0x1ea   : > { %1425 = vmatmul.mubr.bf16.gmra.mrb[28].mxu0 %v669_v33 }
 0x1eb   : > { %1441 = vmatpush3.bf16.msra.mxu0 %v1508_v35 }
 0x1ec   : > { %1442 = vmatprep.subr.bf16.mxu0 %v1509_v36 }
 0x1ef   : > { %1443 = vmatpush3.bf16.msra.mxu0 %v1509_v36  ;;  %v1736_v36 = vld [vmem:[%s1815_s5] ss:$0 sm:$0xff] }
 0x2a5   : > { %v1414_v38 = vpop.f32.mrb[16].mxu0 }
 0x2a6   : > { %v786_v39 = vadd.f32 %v1414_v38, %v1247_v37  ;;  %v777_v40 = vpop.f32.mrb[17].mxu0 }
 0x2a7   : > { %v778_v41 = vadd.f32 %v1247_v37, %v777_v40  ;;  %v1415_v42 = vpop.f32.mrb[18].mxu0 }
 0x2a8   : > { %v789_v43 = vadd.f32 %v1415_v42, %v1247_v37  ;;  %v780_v44 = vpop.f32.mrb[19].mxu0  ;;  %v842_v46 = vmax.f32 %v786_v39, 0.0 }
 0x2a9   : > { %v781_v45 = vadd.f32 %v1247_v37, %v780_v44  ;;  %v840_v48 = vmax.f32 %v778_v41, 0.0 }
 0x2aa   : > { %v843_v47 = vmax.f32 %v789_v43, 0.0 }
 0x2ab   : > { %v841_v49 = vmax.f32 %v781_v45, 0.0 }
 0x2ac   : > { %v857_v50 = vpack.c.bf16 %v843_v47, %v842_v46 }
 0x2ad   : > { %v856_v51 = vpack.c.bf16 %v841_v49, %v840_v48  ;;  %v1418_v52 = vpop.f32.mrb[20].mxu0 }
 0x2ae   : > { %v802_v53 = vadd.f32 %v1418_v52, %v1247_v37  ;;  %v793_v54 = vpop.f32.mrb[21].mxu0 }
 0x2af   : > { %v794_v55 = vadd.f32 %v1247_v37, %v793_v54  ;;  %v1419_v56 = vpop.f32.mrb[22].mxu0  ;;  %1444 = vmatprep.mubr.bf16.mxu0 %v856_v51 }
 0x2b0   : > { %v805_v57 = vadd.f32 %v1419_v56, %v1247_v37  ;;  %v796_v58 = vpop.f32.mrb[23].mxu0  ;;  %1445 = vmatmul.mubr.bf16.vlgmr.msra.gmra.mrb[32].mxu0 %v857_v50  ;;  %v846_v60 = vmax.f32 %v802_v53, 0.0 }
 0x2b1   : > { %v797_v59 = vadd.f32 %v1247_v37, %v796_v58  ;;  %v844_v62 = vmax.f32 %v794_v55, 0.0 }
 0x2b2   : > { %v847_v61 = vmax.f32 %v805_v57, 0.0 }
 0x2b3   : > { %v845_v63 = vmax.f32 %v797_v59, 0.0 }
 0x2b4   : > { %v859_v0 = vpack.c.bf16 %v847_v61, %v846_v60 }
 0x2b5   : > { %v858_v1 = vpack.c.bf16 %v845_v63, %v844_v62  ;;  %v1422_v2 = vpop.f32.mrb[24].mxu0 }
 0x2b6   : > { %v818_v3 = vadd.f32 %v1422_v2, %v1247_v37  ;;  %v809_v4 = vpop.f32.mrb[25].mxu0 }
 0x2b7   : > { %v810_v5 = vadd.f32 %v1247_v37, %v809_v4  ;;  %v1423_v6 = vpop.f32.mrb[26].mxu0  ;;  %1448 = vmatprep.mubr.bf16.mxu1 %v858_v1 }
 0x2b8   : > { %v821_v7 = vadd.f32 %v1423_v6, %v1247_v37  ;;  %v812_v8 = vpop.f32.mrb[27].mxu0  ;;  %1449 = vmatmul.mubr.bf16.vlgmr.msra.gmra.mrb[16].mxu1 %v859_v0  ;;  %v850_v10 = vmax.f32 %v818_v3, 0.0 }
 0x2b9   : > { %v813_v9 = vadd.f32 %v1247_v37, %v812_v8  ;;  %v848_v12 = vmax.f32 %v810_v5, 0.0 }
 0x2ba   : > { %v851_v11 = vmax.f32 %v821_v7, 0.0 }
 0x2bb   : > { %v849_v13 = vmax.f32 %v813_v9, 0.0 }
 0x2bc   : > { %v861_v14 = vpack.c.bf16 %v851_v11, %v850_v10 }
 0x2bd   : > { %v860_v15 = vpack.c.bf16 %v849_v13, %v848_v12  ;;  %v1426_v16 = vpop.f32.mrb[28].mxu0 }
 0x2be   : > { %v834_v17 = vadd.f32 %v1426_v16, %v1247_v37  ;;  %v825_v18 = vpop.f32.mrb[29].mxu0 }
 0x2bf   : > { %v826_v19 = vadd.f32 %v1247_v37, %v825_v18  ;;  %v1427_v20 = vpop.f32.mrb[30].mxu0  ;;  %1452 = vmatprep.mubr.bf16.mxu1 %v860_v15 }
 0x2c0   : > { %v837_v21 = vadd.f32 %v1427_v20, %v1247_v37  ;;  %v828_v22 = vpop.f32.mrb[31].mxu0  ;;  %1453 = vmatmul.mubr.bf16.gmra.mrb[20].mxu1 %v861_v14  ;;  %v854_v24 = vmax.f32 %v834_v17, 0.0 }
 0x2c1   : > { %v829_v23 = vadd.f32 %v1247_v37, %v828_v22  ;;  %v852_v26 = vmax.f32 %v826_v19, 0.0 }
 0x2c2   : > { %v855_v25 = vmax.f32 %v837_v21, 0.0 }
 0x2c3   : > { %v853_v27 = vmax.f32 %v829_v23, 0.0 }
 0x2c4   : > { %v863_v28 = vpack.c.bf16 %v855_v25, %v854_v24 }
 0x2c5   : > { %v862_v29 = vpack.c.bf16 %v853_v27, %v852_v26 }
 0x2c7   : > { %1456 = vmatprep.mubr.bf16.mxu1 %v862_v29 }
 0x2c8   : > { %1457 = vmatmul.mubr.bf16.gmra.mrb[24].mxu1 %v863_v28 }
 0x383   : > { %v1446_v31 = vpop.f32.mrb[32].mxu0 }
 0x384   : > { %v980_v32 = vadd.f32 %v1446_v31, %v1729_v30  ;;  %v971_v33 = vpop.f32.mrb[33].mxu0 }
 0x385   : > { %v972_v34 = vadd.f32 %v1729_v30, %v971_v33  ;;  %v1447_v35 = vpop.f32.mrb[34].mxu0  ;;  %v1283_v33 = vld [vmem:[#allocation2] ss:$0 sm:$0xff] }
 0x386   : > { %v1036_v37 = vmax.f32 %v980_v32, 0.0  ;;  %v983_v38 = vadd.f32 %v1447_v35, %v1729_v30  ;;  %v974_v39 = vpop.f32.mrb[35].mxu0 }
 0x387   : > { %v1034_v40 = vmax.f32 %v972_v34, 0.0  ;;  %v975_v41 = vadd.f32 %v1729_v30, %v974_v39 }
 0x388   : > { %v1037_v42 = vmax.f32 %v983_v38, 0.0  ;;  %v1059_v43 = vmul.f32 %v1736_v36, %v1036_v37 }
 0x389   : > { %v1035_v44 = vmax.f32 %v975_v41, 0.0  ;;  %v1057_v45 = vmul.f32 %v1736_v36, %v1034_v40 }
 0x38a   : > { %1077 = vadd.xlane.f32.xlu1 %v1059_v43  ;;  %v1060_v49 = vmul.f32 %v1736_v36, %v1037_v42 }
 0x38b   : > { %v1450_v46 = vpop.f32.mrb[16].mxu1  ;;  %1073 = vadd.xlane.f32.xlu0 %v1057_v45  ;;  %v1058_v52 = vmul.f32 %v1736_v36, %v1035_v44 }
 0x38c   : > { %v996_v47 = vadd.f32 %v1450_v46, %v1729_v30  ;;  %v987_v48 = vpop.f32.mrb[17].mxu1 }
 0x38d   : > { %v988_v50 = vadd.f32 %v1729_v30, %v987_v48  ;;  %v1451_v51 = vpop.f32.mrb[18].mxu1 }
 0x38e   : > { %v1040_v53 = vmax.f32 %v996_v47, 0.0  ;;  %v999_v54 = vadd.f32 %v1451_v51, %v1729_v30  ;;  %v990_v55 = vpop.f32.mrb[19].mxu1  ;;  %1079 = vadd.xlane.f32.xlu1 %v1060_v49 }
 0x38f   : > { %v991_v56 = vadd.f32 %v1729_v30, %v990_v55  ;;  %1075 = vadd.xlane.f32.xlu0 %v1058_v52  ;;  %v1038_v59 = vmax.f32 %v988_v50, 0.0 }
 0x390   : > { %v1041_v57 = vmax.f32 %v999_v54, 0.0  ;;  %v1063_v58 = vmul.f32 %v1736_v36, %v1040_v53 }
 0x391   : > { %v1039_v60 = vmax.f32 %v991_v56, 0.0  ;;  %v1061_v3 = vmul.f32 %v1736_v36, %v1038_v59 }
 0x392   : > { %v1064_v61 = vmul.f32 %v1736_v36, %v1041_v57 }
 0x393   : > { %v1454_v62 = vpop.f32.mrb[20].mxu1  ;;  %1085 = vadd.xlane.f32.xlu0 %v1063_v58  ;;  %v1062_v7 = vmul.f32 %v1736_v36, %v1039_v60 }
 0x394   : > { %v1012_v63 = vadd.f32 %v1454_v62, %v1729_v30  ;;  %v1003_v0 = vpop.f32.mrb[21].mxu1  ;;  %1087 = vadd.xlane.f32.xlu1 %v1064_v61 }
 0x395   : > { %v1004_v1 = vadd.f32 %v1729_v30, %v1003_v0  ;;  %v1455_v2 = vpop.f32.mrb[22].mxu1 }
 0x396   : > { %v1044_v4 = vmax.f32 %v1012_v63, 0.0  ;;  %v1015_v5 = vadd.f32 %v1455_v2, %v1729_v30  ;;  %v1006_v6 = vpop.f32.mrb[23].mxu1 }
 0x397   : > { %v1007_v8 = vadd.f32 %v1729_v30, %v1006_v6  ;;  %1081 = vadd.xlane.f32.xlu0 %v1061_v3  ;;  %v1042_v11 = vmax.f32 %v1004_v1, 0.0 }
 0x398   : > { %v1045_v9 = vmax.f32 %v1015_v5, 0.0  ;;  %1083 = vadd.xlane.f32.xlu1 %v1062_v7  ;;  %v1067_v10 = vmul.f32 %v1736_v36, %v1044_v4 }
 0x399   : > { %v1043_v12 = vmax.f32 %v1007_v8, 0.0  ;;  %v1065_v19 = vmul.f32 %v1736_v36, %v1042_v11 }
 0x39a   : > { %v1068_v13 = vmul.f32 %v1736_v36, %v1045_v9 }
 0x39b   : > { %v1458_v14 = vpop.f32.mrb[24].mxu1  ;;  %1093 = vadd.xlane.f32.xlu0 %v1067_v10  ;;  %v1066_v21 = vmul.f32 %v1736_v36, %v1043_v12 }
 0x39c   : > { %v1019_v15 = vpop.f32.mrb[25].mxu1  ;;  %1095 = vadd.xlane.f32.xlu1 %v1068_v13  ;;  %v1028_v16 = vadd.f32 %v1458_v14, %v1729_v30 }
 0x39d   : > { %v1020_v17 = vadd.f32 %v1729_v30, %v1019_v15  ;;  %v1459_v18 = vpop.f32.mrb[26].mxu1 }
 0x39e   : > { %v1022_v20 = vpop.f32.mrb[27].mxu1  ;;  %v1031_v23 = vadd.f32 %v1459_v18, %v1729_v30  ;;  %v1048_v25 = vmax.f32 %v1028_v16, 0.0 }
 0x39f   : > { %v1046_v22 = vmax.f32 %v1020_v17, 0.0  ;;  %v1023_v24 = vadd.f32 %v1729_v30, %v1022_v20  ;;  %1089 = vadd.xlane.f32.xlu0 %v1065_v19 }
 0x3a0   : > { %1091 = vadd.xlane.f32.xlu1 %v1066_v21  ;;  %v1049_v28 = vmax.f32 %v1031_v23, 0.0  ;;  %v1071_v31 = vmul.f32 %v1736_v36, %v1048_v25 }
 0x3a1   : > { %v1047_v26 = vmax.f32 %v1023_v24, 0.0  ;;  %v1069_v27 = vmul.f32 %v1736_v36, %v1046_v22 }
 0x3a2   : > { %v1072_v32 = vmul.f32 %v1736_v36, %v1049_v28 }
 0x3a3   : > { %1097 = vadd.xlane.f32.xlu0 %v1069_v27  ;;  %v1070_v29 = vmul.f32 %v1736_v36, %v1047_v26 }
 0x3a5   : > { %1099 = vadd.xlane.f32.xlu1 %v1070_v29 }
 0x3a7   : > { %1101 = vadd.xlane.f32.xlu0 %v1071_v31 }
 0x3a9   : > { %1103 = vadd.xlane.f32.xlu1 %v1072_v32 }
 0x417   : > { %v1078_v30 = vpop.xlane.xlu1 %1077 }
 0x418   : > { %v1114_v34 = vadd.f32 %v1283_v33, %v1078_v30  ;;  %v1074_v35 = vpop.xlane.xlu0 %1073 }
 0x419   : > { %v1112_v37 = vadd.f32 %v1283_v33, %v1074_v35 }
 0x41a   : > { %1131 = vst.msk [vmem:[%s1773_s9 + $0x10] sm:$0xff] %vm1128_vm1, %v1114_v34 }
 0x41b   : > { %1129 = vst.msk [vmem:[%s1773_s9] sm:$0xff] %vm1128_vm1, %v1112_v37  ;;  %v1080_v36 = vpop.xlane.xlu1 %1079 }
 0x41c   : > { %v1115_v38 = vadd.f32 %v1283_v33, %v1080_v36  ;;  %v1076_v39 = vpop.xlane.xlu0 %1075 }
 0x41d   : > { %v1113_v40 = vadd.f32 %v1283_v33, %v1076_v39 }
 0x41e   : > { %1132 = vst.msk [vmem:[%s1773_s9 + $0x18] sm:$0xff] %vm1128_vm1, %v1115_v38 }
 0x41f   : > { %1130 = vst.msk [vmem:[%s1773_s9 + $0x8] sm:$0xff] %vm1128_vm1, %v1113_v40 }
 0x420   : > { %v1086_v41 = vpop.xlane.xlu0 %1085 }
 0x421   : > { %v1118_v42 = vadd.f32 %v1283_v33, %v1086_v41  ;;  %v1088_v43 = vpop.xlane.xlu1 %1087 }
 0x422   : > { %v1119_v44 = vadd.f32 %v1283_v33, %v1088_v43 }
 0x423   : > { %1135 = vst.msk [vmem:[%s1773_s9 + $0x30] sm:$0xff] %vm1128_vm1, %v1118_v42 }
 0x424   : > { %1136 = vst.msk [vmem:[%s1773_s9 + $0x38] sm:$0xff] %vm1128_vm1, %v1119_v44  ;;  %v1082_v45 = vpop.xlane.xlu0 %1081 }
 0x425   : > { %v1116_v46 = vadd.f32 %v1283_v33, %v1082_v45  ;;  %v1084_v47 = vpop.xlane.xlu1 %1083 }
 0x426   : > { %v1117_v48 = vadd.f32 %v1283_v33, %v1084_v47 }
 0x427   : > { %1133 = vst.msk [vmem:[%s1773_s9 + $0x20] sm:$0xff] %vm1128_vm1, %v1116_v46 }
 0x428   : > { %1134 = vst.msk [vmem:[%s1773_s9 + $0x28] sm:$0xff] %vm1128_vm1, %v1117_v48  ;;  %v1094_v49 = vpop.xlane.xlu0 %1093 }
 0x429   : > { %v1122_v50 = vadd.f32 %v1283_v33, %v1094_v49  ;;  %v1096_v51 = vpop.xlane.xlu1 %1095 }
 0x42a   : > { %v1123_v52 = vadd.f32 %v1283_v33, %v1096_v51 }
 0x42b   : > { %1139 = vst.msk [vmem:[%s1773_s9 + $0x50] sm:$0xff] %vm1128_vm1, %v1122_v50 }
 0x42c   : > { %1140 = vst.msk [vmem:[%s1773_s9 + $0x58] sm:$0xff] %vm1128_vm1, %v1123_v52  ;;  %v1090_v53 = vpop.xlane.xlu0 %1089 }
 0x42d   : > { %v1120_v54 = vadd.f32 %v1283_v33, %v1090_v53  ;;  %v1092_v55 = vpop.xlane.xlu1 %1091 }
 0x42e   : > { %v1121_v56 = vadd.f32 %v1283_v33, %v1092_v55 }
 0x42f   : > { %1137 = vst.msk [vmem:[%s1773_s9 + $0x40] sm:$0xff] %vm1128_vm1, %v1120_v54 }
 0x430   : > { %1138 = vst.msk [vmem:[%s1773_s9 + $0x48] sm:$0xff] %vm1128_vm1, %v1121_v56  ;;  %v1098_v57 = vpop.xlane.xlu0 %1097 }
 0x431   : > { %v1124_v58 = vadd.f32 %v1283_v33, %v1098_v57 }
 0x432   : > { %v1100_v59 = vpop.xlane.xlu1 %1099 }
 0x433   : > { %1141 = vst.msk [vmem:[%s1773_s9 + $0x60] sm:$0xff] %vm1128_vm1, %v1124_v58  ;;  %v1125_v60 = vadd.f32 %v1283_v33, %v1100_v59 }
 0x434   : > { %v1102_v61 = vpop.xlane.xlu0 %1101 }
 0x435   : > { %1142 = vst.msk [vmem:[%s1773_s9 + $0x68] sm:$0xff] %vm1128_vm1, %v1125_v60  ;;  %v1126_v62 = vadd.f32 %v1283_v33, %v1102_v61 }
 0x436   : > { %v1104_v63 = vpop.xlane.xlu1 %1103 }
 0x437   : > { %1143 = vst.msk [vmem:[%s1773_s9 + $0x70] sm:$0xff] %vm1128_vm1, %v1126_v62  ;;  %v1127_v0 = vadd.f32 %v1283_v33, %v1104_v63 }
 0x439   : > { %1144 = vst.msk [vmem:[%s1773_s9 + $0x78] sm:$0xff] %vm1128_vm1, %v1127_v0 }
 0x43a PF: > { %s19_s26 = sadd.s32 1, %s1516_s26  }
 0x43b   : > { %p16_p4 = scmp.ge.s32.totalorder %s19_s26, 4  }
 0x43d   :  { %18 = sbr.rel (!%p16_p4) target bundleno = 3 (0x3), region = 82 }

</bundles_post_ra>
